<compile_context>
chip_gen: v7x
topology: tpu7x:2x2x1
jax: 0.10.0
libtpu: 0.0.40
codegen_flags: <defaults>
</compile_context>

<pallas_src>
import jax
import jax.numpy as jnp
from jax.experimental import pallas as pl
from jax.experimental.pallas import tpu as pltpu

DIM = 3          # xyz
HIDDEN = 32      # hidden width of the synthetic energy model
TILE_N = 2048    # atoms per tile (lane dim); 2048 amortizes ~0.35 us/step overhead
N_ATOMS = 8      # small demo size (atoms)

_P_COLS = 2 * DIM + 2   # packed params: [W1^T | b1 | w2 | c] -> 8 columns


def _energy_force_kernel(ra_ref, p_ref, e_ref, fa_ref):
    """Fused forward energy + analytic force for one tile of atoms.

    ra_ref : [3, T]        positions (xyz on sublanes, atoms on lanes)
    p_ref  : [HIDDEN, 8]   packed params: cols 0-2 = W1^T, 3 = b1, 4 = w2,
                           cols 5-7 = c_d = W1^T[:, d] * w2 (prefolded)
    e_ref  : [1, T]        per-atom energy (lane-dense)
    fa_ref : [3, T]        per-atom force  (lane-dense)
    """
    ra = ra_ref[...]                        # [3, T]
    p = p_ref[...]                          # [H, 8]
    w1t = p[:, 0:DIM]                       # [H, 3]
    b1 = p[:, DIM:DIM + 1]                  # [H, 1]
    w2 = p[:, DIM + 1:DIM + 2]              # [H, 1]
    c = p[:, DIM + 2:DIM + 2 + DIM]         # [H, 3]

    # z^T = W1^T @ Ra + b1 as three broadcast MACs on the VPU (K=3: keep off the MXU).
    z = (w1t[:, 0:1] * ra[0:1, :]
         + w1t[:, 1:2] * ra[1:2, :]
         + w1t[:, 2:3] * ra[2:3, :]
         + b1)                              # [H, T]
    h = jnp.tanh(z)                         # EUP: the binding unit (32 tanh/atom)

    # E^T = w2^T @ h : one XLU sublane reduction over HIDDEN.
    e_ref[...] = jnp.sum(w2 * h, axis=0, keepdims=True)        # [1, T]

    # Fa_d = Sum_h c_d[h]*h^2 - Sum_h c_d[h]   (prefolded, no (1-h^2) / *w2 passes)
    hh = h * h                                                   # [H, T]
    s = jnp.sum(c, axis=0, keepdims=True)                        # [1, 3] (tiny)
    f0 = jnp.sum(c[:, 0:1] * hh, axis=0, keepdims=True) - s[:, 0:1]
    f1 = jnp.sum(c[:, 1:2] * hh, axis=0, keepdims=True) - s[:, 1:2]
    f2 = jnp.sum(c[:, 2:3] * hh, axis=0, keepdims=True) - s[:, 2:3]
    # One fused lane-dense [3, T] store instead of three 1-sublane masked stores.
    fa_ref[...] = jnp.concatenate([f0, f1, f2], axis=0)


def _tiling(n):
    """Pick (tile, padded_n).  Small N -> single full-extent block (no copies);
    large N -> TILE_N tiles, which keeps >= 2 parallel grid steps for v7x."""
    if n <= TILE_N:
        return n, n
    n_pad = pl.cdiv(n, TILE_N) * TILE_N
    return TILE_N, n_pad


def make_energy_force_fn(W1, b1, w2):
    """Builds a jitted fn RaT [3, N] -> (E [1, N], Fa [3, N]).

    All constant-parameter glue (transpose / prefold / pack) is done once here.
    """
    W1T = jnp.asarray(W1, jnp.float32).T.reshape(HIDDEN, DIM)     # [H, 3]
    b1c = jnp.asarray(b1, jnp.float32).reshape(HIDDEN, 1)         # [H, 1]
    w2c = jnp.asarray(w2, jnp.float32).reshape(HIDDEN, 1)         # [H, 1]
    cmat = W1T * w2c                                              # [H, 3] prefolded
    params = jnp.concatenate([W1T, b1c, w2c, cmat], axis=1)       # [H, 8] single buffer

    @jax.jit
    def energy_force(RaT):
        n = RaT.shape[1]
        tile, n_pad = _tiling(n)
        ra = RaT.astype(jnp.float32)
        if n_pad != n:
            # Only hit when N > TILE_N and not a multiple of it; callers can pass
            # lane-padded arrays (multiples of TILE_N) to skip this copy entirely.
            ra = jnp.pad(ra, ((0, 0), (0, n_pad - n)))

        e_out, fa_out = pl.pallas_call(
            _energy_force_kernel,
            out_shape=(
                jax.ShapeDtypeStruct((1, n_pad), jnp.float32),
                jax.ShapeDtypeStruct((DIM, n_pad), jnp.float32),
            ),
            grid_spec=pltpu.PrefetchScalarGridSpec(
                num_scalar_prefetch=0,
                grid=(n_pad // tile,),
                in_specs=[
                    pl.BlockSpec((DIM, tile), lambda i: (0, i)),          # Ra tile
                    pl.BlockSpec((HIDDEN, _P_COLS), lambda i: (0, 0)),    # packed params (resident)
                ],
                out_specs=[
                    pl.BlockSpec((1, tile), lambda i: (0, i)),            # E  (lane-dense)
                    pl.BlockSpec((DIM, tile), lambda i: (0, i)),          # Fa (lane-dense)
                ],
            ),
            compiler_params=pltpu.CompilerParams(
                # atom tiles are independent -> megacore-shardable on v7x
                dimension_semantics=("parallel",),
            ),
        )(ra, params)

        if n_pad != n:
            e_out = e_out[:, :n]
            fa_out = fa_out[:, :n]
        return e_out, fa_out

    return energy_force


def force_layer(net_input, energy_force_fn):
    """JAX equivalent of ForceLayer.forward: pass dict through, add 'Fa'."""
    output = dict(net_input)
    _, Fa = energy_force_fn(net_input["Ra"])
    output["Fa"] = Fa                 # Fa = -d(sum E)/d(Ra), same [3, N] layout as Ra
    return output


# Pure-JAX reference (no Pallas) in the conventional [N, 3] layout, for validation.
def _ref_energy(Ra, W1, b1, w2):
    return (jnp.tanh(Ra @ W1 + b1) @ w2)[:, 0]


def _check(n_atoms, energy_force_fn, W1, b1, w2, key):
    Ra_rows = jax.random.normal(key, (n_atoms, DIM), dtype=jnp.float32)
    RaT = Ra_rows.T                                          # atoms on lanes: [3, N]
    E, _ = energy_force_fn(RaT)                              # upstream 'E' entry
    net_input = {"Ra": RaT, "E": E}
    out = force_layer(net_input, energy_force_fn)
    Fa = jax.block_until_ready(out["Fa"])                    # [3, N]

    E_ref = _ref_energy(Ra_rows, W1, b1, w2)
    Fa_ref = -jax.grad(lambda r: jnp.sum(_ref_energy(r, W1, b1, w2)))(Ra_rows)  # [N, 3]
    assert Fa.shape == RaT.shape
    assert jnp.allclose(E[0], E_ref, atol=1e-5, rtol=1e-5), f"energy mismatch (N={n_atoms})"
    assert jnp.allclose(Fa.T, Fa_ref, atol=1e-5, rtol=1e-5), f"force mismatch (N={n_atoms})"


if __name__ == "__main__":
    key = jax.random.PRNGKey(0)
    k_ra1, k_ra2, k_w1, k_b1, k_w2 = jax.random.split(key, 5)

    # deterministic synthetic parameters (conventional [N, 3] energy model)
    W1 = jax.random.normal(k_w1, (DIM, HIDDEN), dtype=jnp.float32) * 0.5
    b1 = jax.random.normal(k_b1, (1, HIDDEN), dtype=jnp.float32) * 0.1
    w2 = jax.random.normal(k_w2, (HIDDEN, 1), dtype=jnp.float32) * 0.5

    energy_force_fn = make_energy_force_fn(W1, b1, w2)

    # Small demo size (single full-extent block: no pad / slice copies at all).
    _check(N_ATOMS, energy_force_fn, W1, b1, w2, k_ra1)
    # Larger ragged size exercising the tiled (TILE_N=2048, grid>=2) path.
    _check(2500, energy_force_fn, W1, b1, w2, k_ra2)

    print("KERNEL_OK")
</pallas_src>

<mosaic_0001>
module attributes {stable_mosaic.version = 11 : i64} {
  func.func @_energy_force_kernel(%arg0: i32, %arg1: memref<3x8xf32, #tpu.memory_space<vmem>>, %arg2: memref<32x8xf32, #tpu.memory_space<vmem>>, %arg3: memref<1x8xf32, #tpu.memory_space<vmem>>, %arg4: memref<3x8xf32, #tpu.memory_space<vmem>>) attributes {dimension_semantics = [#tpu.dimension_semantics<parallel>], iteration_bounds = array<i64: 1>, scalar_prefetch = 0 : i64, scratch_operands = 0 : i64, tpu.core_type = #tpu.core_type<tc>, window_params = [{transform_indices = @transform_0, window_bounds = array<i64: 3, 8>}, {pipeline_mode = #tpu.pipeline_mode<synchronous>, transform_indices = @transform_1, window_bounds = array<i64: 32, 8>}, {transform_indices = @transform_2, window_bounds = array<i64: 1, 8>}, {transform_indices = @transform_3, window_bounds = array<i64: 3, 8>}]} {
    %c0 = arith.constant 0 : index
    %c0_0 = arith.constant 0 : index
    %0 = vector.load %arg1[%c0, %c0_0] : memref<3x8xf32, #tpu.memory_space<vmem>>, vector<3x8xf32>
    %c0_1 = arith.constant 0 : index
    %c0_2 = arith.constant 0 : index
    %1 = vector.load %arg2[%c0_1, %c0_2] : memref<32x8xf32, #tpu.memory_space<vmem>>, vector<32x8xf32>
    %2 = vector.extract_strided_slice %1 {offsets = [0, 0], sizes = [32, 3], strides = [1, 1]} : vector<32x8xf32> to vector<32x3xf32>
    %3 = vector.extract_strided_slice %1 {offsets = [0, 3], sizes = [32, 1], strides = [1, 1]} : vector<32x8xf32> to vector<32x1xf32>
    %4 = vector.extract_strided_slice %1 {offsets = [0, 4], sizes = [32, 1], strides = [1, 1]} : vector<32x8xf32> to vector<32x1xf32>
    %5 = vector.extract_strided_slice %1 {offsets = [0, 5], sizes = [32, 3], strides = [1, 1]} : vector<32x8xf32> to vector<32x3xf32>
    %6 = vector.extract_strided_slice %2 {offsets = [0, 0], sizes = [32, 1], strides = [1, 1]} : vector<32x3xf32> to vector<32x1xf32>
    %7 = vector.extract_strided_slice %0 {offsets = [0, 0], sizes = [1, 8], strides = [1, 1]} : vector<3x8xf32> to vector<1x8xf32>
    %8 = vector.broadcast %6 : vector<32x1xf32> to vector<32x8xf32>
    %9 = vector.broadcast %7 : vector<1x8xf32> to vector<32x8xf32>
    %10 = arith.mulf %8, %9 : vector<32x8xf32>
    %11 = vector.extract_strided_slice %2 {offsets = [0, 1], sizes = [32, 1], strides = [1, 1]} : vector<32x3xf32> to vector<32x1xf32>
    %12 = vector.extract_strided_slice %0 {offsets = [1, 0], sizes = [1, 8], strides = [1, 1]} : vector<3x8xf32> to vector<1x8xf32>
    %13 = vector.broadcast %11 : vector<32x1xf32> to vector<32x8xf32>
    %14 = vector.broadcast %12 : vector<1x8xf32> to vector<32x8xf32>
    %15 = arith.mulf %13, %14 : vector<32x8xf32>
    %16 = arith.addf %10, %15 : vector<32x8xf32>
    %17 = vector.extract_strided_slice %2 {offsets = [0, 2], sizes = [32, 1], strides = [1, 1]} : vector<32x3xf32> to vector<32x1xf32>
    %18 = vector.extract_strided_slice %0 {offsets = [2, 0], sizes = [1, 8], strides = [1, 1]} : vector<3x8xf32> to vector<1x8xf32>
    %19 = vector.broadcast %17 : vector<32x1xf32> to vector<32x8xf32>
    %20 = vector.broadcast %18 : vector<1x8xf32> to vector<32x8xf32>
    %21 = arith.mulf %19, %20 : vector<32x8xf32>
    %22 = arith.addf %16, %21 : vector<32x8xf32>
    %23 = vector.broadcast %3 : vector<32x1xf32> to vector<32x8xf32>
    %24 = arith.addf %22, %23 : vector<32x8xf32>
    %25 = math.tanh %24 : vector<32x8xf32>
    %26 = vector.broadcast %4 : vector<32x1xf32> to vector<32x8xf32>
    %27 = arith.mulf %26, %25 : vector<32x8xf32>
    %cst = arith.constant dense<0.000000e+00> : vector<8xf32>
    %28 = vector.multi_reduction <add>, %27, %cst [0] : vector<32x8xf32> to vector<8xf32>
    %29 = vector.shape_cast %28 : vector<8xf32> to vector<1x8xf32>
    %c0_3 = arith.constant 0 : index
    %c0_4 = arith.constant 0 : index
    %30 = vector.load %arg3[%c0_3, %c0_4] : memref<1x8xf32, #tpu.memory_space<vmem>>, vector<1x8xf32>
    tpu.vector_store %arg3[%c0_3, %c0_4], %29 {strides = array<i32>} : memref<1x8xf32, #tpu.memory_space<vmem>>, vector<1x8xf32>,
    %31 = arith.mulf %25, %25 : vector<32x8xf32>
    %cst_5 = arith.constant dense<0.000000e+00> : vector<3xf32>
    %32 = vector.multi_reduction <add>, %5, %cst_5 [0] : vector<32x3xf32> to vector<3xf32>
    %33 = vector.shape_cast %32 : vector<3xf32> to vector<1x3xf32>
    %34 = vector.extract_strided_slice %5 {offsets = [0, 0], sizes = [32, 1], strides = [1, 1]} : vector<32x3xf32> to vector<32x1xf32>
    %35 = vector.broadcast %34 : vector<32x1xf32> to vector<32x8xf32>
    %36 = arith.mulf %35, %31 : vector<32x8xf32>
    %cst_6 = arith.constant dense<0.000000e+00> : vector<8xf32>
    %37 = vector.multi_reduction <add>, %36, %cst_6 [0] : vector<32x8xf32> to vector<8xf32>
    %38 = vector.shape_cast %37 : vector<8xf32> to vector<1x8xf32>
    %39 = vector.extract_strided_slice %33 {offsets = [0, 0], sizes = [1, 1], strides = [1, 1]} : vector<1x3xf32> to vector<1x1xf32>
    %40 = vector.broadcast %39 : vector<1x1xf32> to vector<1x8xf32>
    %41 = arith.subf %38, %40 : vector<1x8xf32>
    %42 = vector.extract_strided_slice %5 {offsets = [0, 1], sizes = [32, 1], strides = [1, 1]} : vector<32x3xf32> to vector<32x1xf32>
    %43 = vector.broadcast %42 : vector<32x1xf32> to vector<32x8xf32>
    %44 = arith.mulf %43, %31 : vector<32x8xf32>
    %cst_7 = arith.constant dense<0.000000e+00> : vector<8xf32>
    %45 = vector.multi_reduction <add>, %44, %cst_7 [0] : vector<32x8xf32> to vector<8xf32>
    %46 = vector.shape_cast %45 : vector<8xf32> to vector<1x8xf32>
    %47 = vector.extract_strided_slice %33 {offsets = [0, 1], sizes = [1, 1], strides = [1, 1]} : vector<1x3xf32> to vector<1x1xf32>
    %48 = vector.broadcast %47 : vector<1x1xf32> to vector<1x8xf32>
    %49 = arith.subf %46, %48 : vector<1x8xf32>
    %50 = vector.extract_strided_slice %5 {offsets = [0, 2], sizes = [32, 1], strides = [1, 1]} : vector<32x3xf32> to vector<32x1xf32>
    %51 = vector.broadcast %50 : vector<32x1xf32> to vector<32x8xf32>
    %52 = arith.mulf %51, %31 : vector<32x8xf32>
    %cst_8 = arith.constant dense<0.000000e+00> : vector<8xf32>
    %53 = vector.multi_reduction <add>, %52, %cst_8 [0] : vector<32x8xf32> to vector<8xf32>
    %54 = vector.shape_cast %53 : vector<8xf32> to vector<1x8xf32>
    %55 = vector.extract_strided_slice %33 {offsets = [0, 2], sizes = [1, 1], strides = [1, 1]} : vector<1x3xf32> to vector<1x1xf32>
    %56 = vector.broadcast %55 : vector<1x1xf32> to vector<1x8xf32>
    %57 = arith.subf %54, %56 : vector<1x8xf32>
    %58 = tpu.concatenate %41, %49, %57 in 0 : vector<1x8xf32>, vector<1x8xf32>, vector<1x8xf32> -> vector<3x8xf32>
    %c0_9 = arith.constant 0 : index
    %c0_10 = arith.constant 0 : index
    %59 = vector.load %arg4[%c0_9, %c0_10] : memref<3x8xf32, #tpu.memory_space<vmem>>, vector<3x8xf32>
    tpu.vector_store %arg4[%c0_9, %c0_10], %58 {strides = array<i32>} : memref<3x8xf32, #tpu.memory_space<vmem>>, vector<3x8xf32>,
    return
  }
  func.func @transform_0(%arg0: i32) -> (i32, i32) {
    %c0_i32 = arith.constant 0 : i32
    %c0_i32_0 = arith.constant 0 : i32
    return %c0_i32, %arg0 : i32, i32
  }
  func.func @transform_1(%arg0: i32) -> (i32, i32) {
    %c0_i32 = arith.constant 0 : i32
    %c0_i32_0 = arith.constant 0 : i32
    %c0_i32_1 = arith.constant 0 : i32
    return %c0_i32, %c0_i32_0 : i32, i32
  }
  func.func @transform_2(%arg0: i32) -> (i32, i32) {
    %c0_i32 = arith.constant 0 : i32
    %c0_i32_0 = arith.constant 0 : i32
    return %c0_i32, %arg0 : i32, i32
  }
  func.func @transform_3(%arg0: i32) -> (i32, i32) {
    %c0_i32 = arith.constant 0 : i32
    %c0_i32_0 = arith.constant 0 : i32
    return %c0_i32, %arg0 : i32, i32
  }
}

</mosaic_0001>

<bundles_post_ra>
// kernel: energy_force.1
= control target key start
LH: loop header
LB: loop body
LE: loop exit
PB: predicated region body
PF: predicated region fallthrough
CT: control target
= control target key end

     0   :  { %9 = vsyncpa [#allocation3], 0  ;;  %s641_s0 = inlined_call_operand.hbm [shape: f32[3,8], index: 0, kind: input, shape index: {}]   ;;  %s642_s1 = inlined_call_operand.hbm [shape: f32[32,8], index: 1, kind: input, shape index: {}]   ;;  %s643_s2 = inlined_call_operand.hbm [shape: f32[1,8], index: 2, kind: output, shape index: {0}]   ;;  %s644_s3 = inlined_call_operand.hbm [shape: f32[3,8], index: 3, kind: output, shape index: {1}]  }
   0x1   :  { %10 = vsyncpa [#allocation6], 0 }
   0x2   :  { %11 = vsyncpa [#allocation4], 0 }
   0x3   :  { %12 = vsyncpa [#allocation9], 0  ;;  %s502_s12 = smov [#allocation2]   ;;  %s503_s14 = smov [#allocation5]  }
   0x4   :  { %s19_s13 = sshll.u32 %s502_s12, 4  ;;  %s28_s15 = sshll.u32 %s503_s14, 4  ;;  %s20_s13 = int_to_ptr.vmem [resolvable:$true] %s19_s13  ;;  %s536_s15 = int_to_ptr.vmem [resolvable:$true] %s28_s15 }
   0x5   :  { %s406_s18 = scalar_lea.hbm %s641_s0, 64 }
   0x6   :  { %p407_p0 = scmp.ne.s32.totalorder %s641_s0, %s406_s18  ;;  %p410_p1 = scmp.lt.u32.totalorder %s406_s18, %s641_s0 }
   0x8   :  { %p412_p2 = pnand %p410_p1, %p407_p0 }
   0xa   :  { %415 = shalt.err (!%p412_p2)
}
   0xb   :  { %s416_s23 = scalar_lea.vmem %s20_s13, 64  ;;  %p421_p4 = scmp.lt.s32.totalorder %s20_s13, %s20_s13 }
   0xc   :  { %p417_p3 = scmp.ne.s32.totalorder %s20_s13, %s416_s23  ;;  %p422_p5 = scmp.lt.s32.totalorder %s416_s23, %s416_s23 }
   0xe   :  { %p423_p6 = por %p422_p5, %p421_p4 }
  0x10   :  { %p424_p7 = pnand %p423_p6, %p417_p3 }
  0x12   :  { %427 = shalt.err (!%p424_p7)
}
  0x13   :  { %22 = dma.hbm_to_vmem [thread:$0]  %s641_s0, 64, %s20_s13, [#allocation3]  }
  0x14   :  { %s428_s28 = scalar_lea.hbm %s642_s1, 512 }
  0x15   :  { %p429_p8 = scmp.ne.s32.totalorder %s642_s1, %s428_s28  ;;  %p432_p9 = scmp.lt.u32.totalorder %s428_s28, %s642_s1 }
  0x17   :  { %p434_p10 = pnand %p432_p9, %p429_p8 }
  0x19   :  { %437 = shalt.err (!%p434_p10)
}
  0x1a   :  { %s438_s6 = scalar_lea.vmem %s536_s15, 512  ;;  %p443_p12 = scmp.lt.s32.totalorder %s536_s15, %s536_s15 }
  0x1b   :  { %p439_p11 = scmp.ne.s32.totalorder %s536_s15, %s438_s6  ;;  %p444_p13 = scmp.lt.s32.totalorder %s438_s6, %s438_s6 }
  0x1d   :  { %p445_p0 = por %p444_p13, %p443_p12 }
  0x1f   :  { %p446_p1 = pnand %p445_p0, %p439_p11 }
  0x21   :  { %449 = shalt.err (!%p446_p1)
}
  0x22   :  { %s504_s0 = smov 128   ;;  %s505_s7 = smov 8  }
  0x23   :  { %34 = dma.hbm_to_vmem [thread:$0]  %s642_s1, 512, %s536_s15, [#allocation6], %s504_s0, %s504_s0, %s505_s7  }
  0x24   :  { %494 = dma.done.wait [#allocation3], 64  }
  0x25   :  { %495 = vsyncadd [#allocation3], 4294967232 }
  0x26   :  { %496 = dma.done.wait [#allocation6], 512  }
  0x27   :  { %497 = vsyncadd [#allocation6], 4294966784  ;;  %v506_v0 = vmov 0   ;;  %v567_v1 = vld [vmem:[#allocation5 + $0x10] sm:$0xff]  ;;  %v569_v2 = vld [vmem:[#allocation5] sm:$0xff]  ;;  %v507_v5 = vmov 1   ;;  %v66_v32 = vlaneseq }
  0x28   :  { %374 = vset.pattern.permute.xlu1 %v506_v0  ;;  %373 = vset.pattern.permute.xlu0 %v506_v0  ;;  %v573_v3 = vld [vmem:[#allocation5 + $0x18] sm:$0xff]  ;;  %v43_v4 = vld [vmem:[#allocation5 + $0x8] sm:$0xff]  ;;  %vm194_vm0 = vcmask 64552   ;;  %v508_v6 = vmov 2   ;;  %v509_v11 = vmov 3   ;;  %v510_v15 = vmov 5  }
  0x29   :  { %58 = vperm.xlu1 %374, %v567_v1   ;;  %48 = vperm.xlu0 %373, %v569_v2   ;;  %v195_v7 = vsel %vm194_vm0, %v569_v2, 0.0  ;;  %v196_v8 = vsel %vm194_vm0, %v43_v4, 0.0  ;;  %v198_v10 = vsel %vm194_vm0, %v567_v1, 0.0  ;;  %v200_v13 = vsel %vm194_vm0, %v573_v3, 0.0  ;;  %v41_v40 = vld [vmem:[#allocation2] sm:$0x7] }
  0x2a   :  { %v197_v9 = vadd.f32 %v196_v8, %v195_v7  ;;  %v511_v17 = vmov 6   ;;  %v512_v20 = vmov 4   ;;  %v513_v22 = vmov 7   ;;  %s514_s1 = smov [#allocation8]   ;;  %s515_s11 = smov [#allocation7]  }
  0x2b   :  { %v67_v35 = vshrl.u32 %v66_v32, 7  ;;  %vm174_vm1 = vcmask 64512   ;;  %vm323_vm2 = vcmask 1040384   ;;  %s345_s10 = sshll.u32 %s514_s1, 4  ;;  %vm325_vm3 = vcmask 1041408   ;;  %s335_s12 = sshll.u32 %s515_s11, 4  ;;  %s346_s10 = int_to_ptr.vmem [resolvable:$true] %s345_s10  ;;  %s336_s12 = int_to_ptr.vmem [resolvable:$true] %s335_s12 }
  0x2c   :  { %v199_v12 = vadd.f32 %v198_v10, %v197_v9  ;;  %vm327_vm4 = vcmask 59392   ;;  %vm188_vm5 = vcmask 57344   ;;  %s450_s13 = scalar_lea.vmem %s346_s10, 64  ;;  %p455_p3 = scmp.lt.s32.totalorder %s346_s10, %s346_s10 }
  0x2d   :  { %63 = vperm.xlu1 %374, %v573_v3   ;;  %53 = vperm.xlu0 %373, %v43_v4   ;;  %v68_v37 = vsub.s32 0, %v67_v35  ;;  %v92_v38 = vsub.s32 1, %v67_v35  ;;  %v120_v42 = vsub.s32 2, %v67_v35  ;;  %p451_p2 = scmp.ne.s32.totalorder %s346_s10, %s450_s13  ;;  %p456_p4 = scmp.lt.s32.totalorder %s450_s13, %s450_s13 }
  0x2e   :  { %v201_v14 = vadd.f32 %v200_v13, %v199_v12 }
  0x2f   :  { %v69_v43 = vrot.slane %v41_v40, %v68_v37  ;;  %v93_v44 = vrot.slane %v41_v40, %v92_v38  ;;  %v121_v47 = vrot.slane %v41_v40, %v120_v42  ;;  %p457_p5 = por %p456_p4, %p455_p3 }
  0x30   :  { %v202_v16 = vrot.slane %v201_v14, 4 }
  0x31   :  { %376 = vset.pattern.permute.xlu1 %v507_v5  ;;  %375 = vset.pattern.permute.xlu0 %v507_v5  ;;  %p458_p6 = pnand %p457_p5, %p451_p2 }
  0x32   :  { %79 = vperm.xlu1 %376, %v43_v4   ;;  %75 = vperm.xlu0 %375, %v569_v2   ;;  %v203_v18 = vadd.f32 %v202_v16, %v201_v14 }
  0x34   :  { %v204_v19 = vrot.slane %v203_v18, 2 }
  0x36   :  { %83 = vperm.xlu1 %376, %v567_v1   ;;  %87 = vperm.xlu0 %375, %v573_v3   ;;  %v205_v21 = vadd.f32 %v204_v19, %v203_v18 }
  0x38   :  { %v206_v23 = vrot.slane %v205_v21, 1 }
  0x3a   :  { %377 = vset.pattern.permute.xlu1 %v508_v6  ;;  %378 = vset.pattern.permute.xlu0 %v508_v6  ;;  %v207_v24 = vadd.f32 %v206_v23, %v205_v21 }
  0x3b   :  { %103 = vperm.xlu1 %377, %v569_v2   ;;  %107 = vperm.xlu0 %378, %v43_v4  }
  0x3f   :  { %111 = vperm.xlu1 %377, %v567_v1   ;;  %379 = vset.pattern.permute.xlu0 %v509_v11 }
  0x40   :  { %131 = vperm.xlu0 %379, %v569_v2  }
  0x43   :  { %115 = vperm.xlu1 %377, %v573_v3  }
  0x44   :  { %143 = vperm.xlu0 %379, %v573_v3  }
  0x47   :  { %380 = vset.pattern.permute.xlu1 %v509_v11 }
  0x48   :  { %135 = vperm.xlu1 %380, %v43_v4   ;;  %382 = vset.pattern.permute.xlu0 %v510_v15 }
  0x49   :  { %213 = vperm.xlu0 %382, %v43_v4  }
  0x4c   :  { %139 = vperm.xlu1 %380, %v567_v1  }
  0x4d   :  { %386 = vset.pattern.permute.xlu0 %v511_v17 }
  0x4e   :  { %256 = vperm.xlu0 %386, %v567_v1  }
  0x50   :  { %381 = vset.pattern.permute.xlu1 %v510_v15 }
  0x51   :  { %209 = vperm.xlu1 %381, %v569_v2  }
  0x52   :  { %389 = vset.pattern.permute.xlu0 %v512_v20 }
  0x53   :  { %159 = vperm.xlu0 %389, %v43_v4  }
  0x55   :  { %383 = vset.pattern.permute.xlu1 %v511_v17 }
  0x56   :  { %248 = vperm.xlu1 %383, %v569_v2  }
  0x57   :  { %390 = vset.pattern.permute.xlu0 %v513_v22 }
  0x58   :  { %286 = vperm.xlu0 %390, %v569_v2  }
  0x5a   :  { %252 = vperm.xlu1 %383, %v43_v4  }
  0x5c   :  { %298 = vperm.xlu0 %390, %v573_v3  }
  0x5e   :  { %384 = vset.pattern.permute.xlu1 %v513_v22 }
  0x5f   :  { %290 = vperm.xlu1 %384, %v43_v4  }
  0x60   :  { %394 = vset.pattern.permute.xlu0 %v510_v15 }
  0x61   :  { %243 = vperm.xlu0 %394, %v207_v24  }
  0x63   :  { %385 = vset.pattern.permute.xlu1 %v510_v15 }
  0x64   :  { %217 = vperm.xlu1 %385, %v567_v1  }
  0x65   :  { %397 = vset.pattern.permute.xlu0 %v513_v22 }
  0x68   :  { %387 = vset.pattern.permute.xlu1 %v513_v22 }
  0x69   :  { %294 = vperm.xlu1 %387, %v567_v1  }
  0x6d   :  { %388 = vset.pattern.permute.xlu1 %v512_v20 }
  0x6e   :  { %155 = vperm.xlu1 %388, %v569_v2  }
  0x72   :  { %391 = vset.pattern.permute.xlu1 %v510_v15 }
  0x73   :  { %221 = vperm.xlu1 %391, %v573_v3  }
  0x77   :  { %392 = vset.pattern.permute.xlu1 %v511_v17 }
  0x78   :  { %260 = vperm.xlu1 %392, %v573_v3  }
  0x7c   :  { %393 = vset.pattern.permute.xlu1 %v512_v20 }
  0x7d   :  { %163 = vperm.xlu1 %393, %v567_v1  }
  0x81   :  { %167 = vperm.xlu1 %393, %v573_v3  }
  0x85   :  { %395 = vset.pattern.permute.xlu1 %v511_v17 }
  0x86   :  { %281 = vperm.xlu1 %395, %v207_v24  }
  0x8a   :  { %396 = vset.pattern.permute.xlu1 %v513_v22 }
  0x8b   :  { %319 = vperm.xlu1 %396, %v207_v24  }
  0xa8   :  { %v59_v25 = vpop.permute.xlu1 %58  ;;  %v49_v26 = vpop.permute.xlu0 %48 }
  0xa9   :  { %v70_v45 = vmul.f32 %v69_v43, %v49_v26  ;;  %v72_v62 = vmul.f32 %v69_v43, %v59_v25 }
  0xac   :  { %v64_v27 = vpop.permute.xlu1 %63  ;;  %v54_v28 = vpop.permute.xlu0 %53 }
  0xad   :  { %v71_v50 = vmul.f32 %v69_v43, %v54_v28  ;;  %v73_v1 = vmul.f32 %v69_v43, %v64_v27 }
  0xb1   :  { %v80_v29 = vpop.permute.xlu1 %79  ;;  %v76_v30 = vpop.permute.xlu0 %75 }
  0xb2   :  { %v94_v46 = vmul.f32 %v93_v44, %v76_v30  ;;  %v95_v51 = vmul.f32 %v93_v44, %v80_v29 }
  0xb4   :  { %v98_v52 = vadd.f32 %v94_v46, %v70_v45  ;;  %v99_v57 = vadd.f32 %v95_v51, %v71_v50 }
  0xb5   :  { %v84_v31 = vpop.permute.xlu1 %83  ;;  %v88_v34 = vpop.permute.xlu0 %87 }
  0xb6   :  { %v96_v58 = vmul.f32 %v93_v44, %v84_v31  ;;  %v97_v59 = vmul.f32 %v93_v44, %v88_v34 }
  0xb8   :  { %v100_v5 = vadd.f32 %v96_v58, %v72_v62  ;;  %v101_v6 = vadd.f32 %v97_v59, %v73_v1 }
  0xba   :  { %v104_v33 = vpop.permute.xlu1 %103  ;;  %v108_v39 = vpop.permute.xlu0 %107 }
  0xbb   :  { %v122_v53 = vmul.f32 %v121_v47, %v104_v33  ;;  %v123_v54 = vmul.f32 %v121_v47, %v108_v39 }
  0xbd   :  { %v126_v60 = vadd.f32 %v122_v53, %v98_v52  ;;  %v127_v61 = vadd.f32 %v123_v54, %v99_v57 }
  0xbe   :  { %v112_v36 = vpop.permute.xlu1 %111 }
  0xbf   :  { %v132_v48 = vpop.permute.xlu0 %131  ;;  %v124_v63 = vmul.f32 %v121_v47, %v112_v36 }
  0xc0   :  { %v146_v7 = vadd.f32 %v132_v48, %v126_v60 }
  0xc1   :  { %v128_v8 = vadd.f32 %v124_v63, %v100_v5 }
  0xc2   :  { %v116_v41 = vpop.permute.xlu1 %115 }
  0xc3   :  { %v144_v55 = vpop.permute.xlu0 %143  ;;  %v125_v2 = vmul.f32 %v121_v47, %v116_v41 }
  0xc5   :  { %v129_v9 = vadd.f32 %v125_v2, %v101_v6 }
  0xc7   :  { %v136_v49 = vpop.permute.xlu1 %135  ;;  %v149_v13 = vadd.f32 %v144_v55, %v129_v9 }
  0xc8   :  { %v147_v3 = vadd.f32 %v136_v49, %v127_v61  ;;  %v214_v4 = vpop.permute.xlu0 %213 }
  0xca   :  { %398 = vtanh.f32 %v147_v3 }
  0xcb   :  { %v140_v56 = vpop.permute.xlu1 %139  ;;  %400 = vtanh.f32 %v146_v7 }
  0xcc   :  { %v148_v11 = vadd.f32 %v140_v56, %v128_v8 }
  0xcd   :  { %v257_v12 = vpop.permute.xlu0 %256 }
  0xce   :  { %402 = vtanh.f32 %v148_v11 }
  0xcf   :  { %404 = vtanh.f32 %v149_v13 }
  0xd0   :  { %v210_v0 = vpop.permute.xlu1 %209 }
  0xd2   :  { %v160_v15 = vpop.permute.xlu0 %159 }
  0xd4   :  { %v399_v17 = vpop.eup %398 }
  0xd5   :  { %v249_v10 = vpop.permute.xlu1 %248  ;;  %v401_v18 = vpop.eup %400  ;;  %v191_v19 = vmul.f32 %v399_v17, %v399_v17  ;;  %v171_v5 = vmul.f32 %v399_v17, %v160_v15 }
  0xd6   :  { %v190_v23 = vmul.f32 %v401_v18, %v401_v18 }
  0xd7   :  { %v287_v20 = vpop.permute.xlu0 %286  ;;  %v225_v34 = vmul.f32 %v214_v4, %v191_v19 }
  0xd8   :  { %v403_v22 = vpop.eup %402  ;;  %v301_v25 = vmul.f32 %v287_v20, %v190_v23  ;;  %v224_v38 = vmul.f32 %v210_v0, %v190_v23  ;;  %v263_v44 = vmul.f32 %v249_v10, %v190_v23 }
  0xd9   :  { %v253_v14 = vpop.permute.xlu1 %252  ;;  %v405_v26 = vpop.eup %404  ;;  %v192_v27 = vmul.f32 %v403_v22, %v403_v22  ;;  %v229_v43 = vsel %vm174_vm1, %v225_v34, 0.0 }
  0xda   :  { %v305_v32 = vsel %vm174_vm1, %v301_v25, 0.0  ;;  %v193_v33 = vmul.f32 %v405_v26, %v405_v26  ;;  %v264_v42 = vmul.f32 %v253_v14, %v191_v19  ;;  %v228_v46 = vsel %vm174_vm1, %v224_v38, 0.0 }
  0xdb   :  { %v299_v30 = vpop.permute.xlu0 %298  ;;  %v265_v49 = vmul.f32 %v257_v12, %v192_v27  ;;  %v230_v50 = vadd.f32 %v229_v43, %v228_v46  ;;  %v267_v54 = vsel %vm174_vm1, %v263_v44, 0.0  ;;  %v176_v14 = vsel %vm174_vm1, %v171_v5, 0.0 }
  0xdc   :  { %v304_v37 = vmul.f32 %v299_v30, %v193_v33  ;;  %v268_v51 = vsel %vm174_vm1, %v264_v42, 0.0 }
  0xdd   :  { %v269_v56 = vadd.f32 %v268_v51, %v267_v54  ;;  %v270_v59 = vsel %vm174_vm1, %v265_v49, 0.0 }
  0xde   :  { %v291_v16 = vpop.permute.xlu1 %290  ;;  %v310_v45 = vsel %vm174_vm1, %v304_v37, 0.0 }
  0xdf   :  { %v302_v24 = vmul.f32 %v291_v16, %v191_v19  ;;  %v271_v1 = vadd.f32 %v270_v59, %v269_v56 }
  0xe1   :  { %v306_v28 = vsel %vm174_vm1, %v302_v24, 0.0 }
  0xe2   :  { %v307_v35 = vadd.f32 %v306_v28, %v305_v32 }
  0xe3   :  { %v218_v21 = vpop.permute.xlu1 %217 }
  0xe4   :  { %v226_v39 = vmul.f32 %v218_v21, %v192_v27 }
  0xe6   :  { %v231_v47 = vsel %vm174_vm1, %v226_v39, 0.0 }
  0xe7   :  { %v232_v55 = vadd.f32 %v231_v47, %v230_v50 }
  0xe8   :  { %v295_v29 = vpop.permute.xlu1 %294 }
  0xe9   :  { %v303_v31 = vmul.f32 %v295_v29, %v192_v27 }
  0xeb   :  { %v308_v36 = vsel %vm174_vm1, %v303_v31, 0.0 }
  0xec   :  { %v309_v40 = vadd.f32 %v308_v36, %v307_v35 }
  0xed   :  { %v156_v41 = vpop.permute.xlu1 %155 }
  0xee   :  { %v311_v48 = vadd.f32 %v310_v45, %v309_v40  ;;  %v170_v0 = vmul.f32 %v401_v18, %v156_v41 }
  0xf0   :  { %v312_v57 = vrot.slane %v311_v48, 4  ;;  %v175_v9 = vsel %vm174_vm1, %v170_v0, 0.0 }
  0xf1   :  { %v177_v19 = vadd.f32 %v176_v14, %v175_v9 }
  0xf2   :  { %v222_v52 = vpop.permute.xlu1 %221  ;;  %v313_v2 = vadd.f32 %v312_v57, %v311_v48 }
  0xf3   :  { %v227_v53 = vmul.f32 %v222_v52, %v193_v33 }
  0xf4   :  { %v314_v12 = vrot.slane %v313_v2, 2 }
  0xf5   :  { %v233_v58 = vsel %vm174_vm1, %v227_v53, 0.0 }
  0xf6   :  { %v234_v60 = vadd.f32 %v233_v58, %v232_v55  ;;  %v315_v15 = vadd.f32 %v314_v12, %v313_v2 }
  0xf7   :  { %v261_v61 = vpop.permute.xlu1 %260 }
  0xf8   :  { %v235_v62 = vrot.slane %v234_v60, 4  ;;  %v266_v63 = vmul.f32 %v261_v61, %v193_v33  ;;  %v316_v31 = vrot.slane %v315_v15, 1  ;;  %v244_v33 = vpop.permute.xlu0 %243 }
  0xfa   :  { %v236_v3 = vadd.f32 %v235_v62, %v234_v60  ;;  %v272_v4 = vsel %vm174_vm1, %v266_v63, 0.0 }
  0xfb   :  { %v273_v6 = vadd.f32 %v272_v4, %v271_v1 }
  0xfc   :  { %v164_v7 = vpop.permute.xlu1 %163  ;;  %v237_v8 = vrot.slane %v236_v3, 2 }
  0xfd   :  { %v274_v10 = vrot.slane %v273_v6, 4  ;;  %v172_v11 = vmul.f32 %v403_v22, %v164_v7 }
  0xfe   :  { %v238_v13 = vadd.f32 %v237_v8, %v236_v3 }
  0xff   :  { %v275_v16 = vadd.f32 %v274_v10, %v273_v6  ;;  %v178_v18 = vsel %vm174_vm1, %v172_v11, 0.0 }
 0x100   :  { %v168_v20 = vpop.permute.xlu1 %167  ;;  %v239_v23 = vrot.slane %v238_v13, 1  ;;  %v179_v17 = vadd.f32 %v178_v18, %v177_v19 }
 0x101   :  { %v173_v21 = vmul.f32 %v405_v26, %v168_v20  ;;  %v276_v24 = vrot.slane %v275_v16, 2  ;;  %v317_v26 = vadd.f32 %v316_v31, %v315_v15 }
 0x102   :  { %v240_v29 = vadd.f32 %v239_v23, %v238_v13 }
 0x103   :  { %v180_v25 = vsel %vm174_vm1, %v173_v21, 0.0  ;;  %v277_v27 = vadd.f32 %v276_v24, %v275_v16 }
 0x104   :  { %v181_v28 = vadd.f32 %v180_v25, %v179_v17  ;;  %v246_v36 = vsub.f32 %v240_v29, %v244_v33 }
 0x105   :  { %v282_v22 = vpop.permute.xlu1 %281  ;;  %v278_v30 = vrot.slane %v277_v27, 1 }
 0x106   :  { %v182_v32 = vrot.slane %v181_v28, 4 }
 0x107   :  { %v279_v34 = vadd.f32 %v278_v30, %v277_v27 }
 0x108   :  { %v183_v35 = vadd.f32 %v182_v32, %v181_v28 }
 0x109   :  { %v284_v37 = vsub.f32 %v279_v34, %v282_v22 }
 0x10a   :  { %v184_v38 = vrot.slane %v183_v35, 2  ;;  %v320_v39 = vpop.permute.xlu1 %319 }
 0x10b   :  { %v324_v40 = vsel %vm323_vm2, %v246_v36, %v284_v37  ;;  %v322_v41 = vsub.f32 %v317_v26, %v320_v39 }
 0x10c   :  { %v185_v42 = vadd.f32 %v184_v38, %v183_v35 }
 0x10d   :  { %v326_v43 = vsel %vm325_vm3, %v324_v40, %v322_v41 }
 0x10e   :  { %v186_v44 = vrot.slane %v185_v42, 1  ;;  %328 = vst.msk [vmem:[#allocation8] sm:$0x7] %vm327_vm4, %v326_v43 }
 0x10f   :  { %461 = shalt.err (!%p458_p6)
}
 0x110   :  { %s462_s16 = scalar_lea.hbm %s644_s3, 64 }
 0x111   :  { %p463_p7 = scmp.ne.s32.totalorder %s644_s3, %s462_s16  ;;  %p466_p8 = scmp.lt.u32.totalorder %s462_s16, %s644_s3 }
 0x113   :  { %p468_p9 = pnand %p466_p8, %p463_p7 }
 0x115   :  { %471 = shalt.err (!%p468_p9)
}
 0x116   :  { %348 = dma.vmem_to_hbm [thread:$0]  %s346_s10, 64, %s644_s3, [#allocation9]   ;;  %v187_v45 = vadd.f32 %v186_v44, %v185_v42 }
 0x117   :  { %s472_s23 = scalar_lea.vmem %s336_s12, 16  ;;  %s476_s24 = scalar_lea.vmem %s336_s12, 32 }
 0x118   :  { %189 = vst.msk [vmem:[#allocation7] sm:$0x1] %vm188_vm5, %v187_v45  ;;  %p473_p10 = scmp.ne.s32.totalorder %s336_s12, %s472_s23  ;;  %p477_p11 = scmp.lt.s32.totalorder %s336_s12, %s336_s12 }
 0x119   :  { %p478_p12 = scmp.lt.s32.totalorder %s476_s24, %s472_s23 }
 0x11b   :  { %p479_p13 = por %p478_p12, %p477_p11 }
 0x11d   :  { %p480_p0 = pnand %p479_p13, %p473_p10 }
 0x11f   :  { %483 = shalt.err (!%p480_p0)
}
 0x120   :  { %s484_s27 = scalar_lea.hbm %s643_s2, 16 }
 0x121   :  { %p485_p1 = scmp.ne.s32.totalorder %s643_s2, %s484_s27  ;;  %p488_p2 = scmp.lt.u32.totalorder %s484_s27, %s643_s2 }
 0x123   :  { %p490_p3 = pnand %p488_p2, %p485_p1 }
 0x125   :  { %493 = shalt.err (!%p490_p3)
}
 0x126   :  { %338 = dma.vmem_to_hbm [thread:$0]  %s336_s12, 16, %s643_s2, [#allocation4]  }
 0x127   :  { %498 = dma.done.wait [#allocation4], 16  }
 0x128   :  { %499 = vsyncadd [#allocation4], 4294967280 }
 0x129   :  { %500 = dma.done.wait [#allocation9], 64  }
 0x12a   :  { %501 = vsyncadd [#allocation9], 4294967232 }
 0x12b   :  { %355 = vsyncpa [#allocation3], 1 }
 0x12c   :  { %356 = vsyncpa [#allocation6], 1 }
 0x12d   :  { %357 = vsyncpa [#allocation4], 1 }
 0x12e   :  { %358 = vsyncpa [#allocation9], 1 }

</bundles_post_ra>
